<compile_context>
chip_gen: v7x
topology: tpu7x:2x2x1
jax: 0.10.0
libtpu: 0.0.40
codegen_flags: <defaults>
</compile_context>

<pallas_src>
import jax
import jax.numpy as jnp
from jax import lax
from jax.experimental import pallas as pl
from jax.experimental.pallas import tpu as pltpu


def _round_up(x, m):
    return ((x + m - 1) // m) * m


# Contract last dim of x (tm, tk) with last dim of weight (tn, tk) -> (tm, tn).
_CONTRACT_LAST = (((1,), (1,)), ((), ()))


def _row_linear_kernel_multik(x_ref, w_ref, b_ref, o_ref, acc_ref):
    """grid = (Mp//tm, Np//tn, Kp//tk); K is the innermost reduction axis."""
    k = pl.program_id(2)

    part = lax.dot_general(
        x_ref[...], w_ref[...], _CONTRACT_LAST,
        preferred_element_type=jnp.float32,
    )

    @pl.when(k == 0)
    def _():
        # Fold the f32 bias into the accumulator init: no zero-store, no
        # read-modify-write on the first K step, and the epilogue is just a cast.
        acc_ref[...] = part + b_ref[...]

    @pl.when(k > 0)
    def _():
        acc_ref[...] += part

    @pl.when(k == pl.num_programs(2) - 1)
    def _():
        o_ref[...] = acc_ref[...].astype(o_ref.dtype)


def _row_linear_kernel_singlek(x_ref, w_ref, b_ref, o_ref):
    """Fast path when all of K fits one tile: no accumulator scratch at all."""
    part = lax.dot_general(
        x_ref[...], w_ref[...], _CONTRACT_LAST,
        preferred_element_type=jnp.float32,
    )
    o_ref[...] = (part + b_ref[...]).astype(o_ref.dtype)


def _pick_tile(dim, max_tile, granule):
    """Tile size (multiple of `granule`, <= max_tile) with bounded padding waste.

    If the whole dim fits one max_tile, use round_up(dim, granule).  Otherwise
    pick the tile minimizing padded-extent waste, allowing up to ~6% extra
    padding in exchange for a larger tile (fewer grid steps, less re-streaming
    of the other operand); ties prefer 256-aligned tiles (v6e/v7x MXU width).
    """
    padded_min = _round_up(dim, granule)
    if padded_min <= max_tile:
        return padded_min
    cands = []
    for t in range(granule, max_tile + 1, granule):
        padded = _round_up(dim, t)
        cands.append((t, (padded - dim) / padded))
    min_waste = min(w for _, w in cands)
    ok = [t for t, w in cands if w <= min_waste + 1.0 / 16.0]
    return max(ok, key=lambda t: (t % 256 == 0, t))


def row_linear(x, weight, bias=None, *, compute_dtype=None, tm=None, tn=None, tk=None):
    """y = x @ weight.T + bias, computed by a Pallas TPU kernel.

    x:      (..., in_features)
    weight: (out_features, in_features)   -- native RowLinear layout, never transposed
    bias:   (out_features,) or None
    compute_dtype: optional low-precision MXU operand dtype (e.g. jnp.bfloat16);
                   accumulation and bias stay f32, output dtype follows x.dtype.
    """
    orig_shape = x.shape
    K = orig_shape[-1]
    N, K_w = weight.shape
    assert K == K_w, "in_features mismatch"
    out_dtype = x.dtype  # output follows the activation dtype (module's self.dtype)

    x2d = x.reshape(-1, K)
    M = x2d.shape[0]

    w = weight
    if compute_dtype is not None:
        # Opt-in low-precision fast path (bf16 operands, f32 accumulate).
        x2d = x2d.astype(compute_dtype)
        w = w.astype(compute_dtype)
    elif w.dtype != x2d.dtype:
        # Mixed dtypes: compute in the activation dtype; output stays x.dtype.
        w = w.astype(x2d.dtype)

    itemsize = jnp.dtype(x2d.dtype).itemsize
    # Sublane packing: 8 rows (f32), 16 (bf16/fp16), 32 (int8/fp8).
    sub = max(8, 32 // itemsize)

    # ---- tile selection ---------------------------------------------------
    if tm is None:
        tm = _pick_tile(M, 512, sub)
    if tn is None:
        tn = _pick_tile(N, 1024, 128)
    if tk is None:
        tk_max = 1024 if itemsize <= 2 else 512
        tk = _pick_tile(K, tk_max, 128)

    Mp = _round_up(M, tm)
    Np = _round_up(N, tn)
    Kp = _round_up(K, tk)

    # Guarantee >=2 "parallel" grid tiles on decode-style (1,1,K) grids so both
    # v7x TensorCores get work (harmless elsewhere: only the N axis is split).
    if Mp // tm == 1 and Np // tn == 1 and tn >= 256 and tn % 256 == 0:
        tn //= 2

    grid = (Mp // tm, Np // tn, Kp // tk)
    multi_k = grid[2] > 1

    # ---- operand preparation ------------------------------------------------
    # Weight stays (N, K): only padded when N/K are not multiples of 128.
    # NOTE: hoist this padding to weight-load time in production for such shapes.
    if (Mp, Kp) != (M, K):
        x2d = jnp.pad(x2d, ((0, Mp - M), (0, Kp - K)))
    if (Np, Kp) != (N, K):
        w = jnp.pad(w, ((0, Np - N), (0, Kp - K)))

    if bias is None:
        bias2d = jnp.zeros((1, Np), jnp.float32)
    else:
        bias2d = bias.astype(jnp.float32).reshape(1, N)
        if Np != N:
            bias2d = jnp.pad(bias2d, ((0, 0), (0, Np - N)))

    # ---- VMEM budget (actual footprint) & cost hint --------------------------
    o_bytes = jnp.dtype(out_dtype).itemsize
    footprint = (
        2 * tm * tk * itemsize          # x tiles, double-buffered
        + 2 * tn * tk * itemsize        # weight tiles, double-buffered
        + 2 * tm * tn * o_bytes         # output tiles, double-buffered
        + 2 * tn * 4                    # bias tile (f32), double-buffered
        + (tm * tn * 4 if multi_k else 0)  # f32 accumulator scratch
    )
    try:
        phys_vmem = int(pltpu.get_tpu_info().vmem_capacity_bytes)
    except Exception:
        phys_vmem = 64 * 1024 * 1024    # conservative fallback (v7x-sized)
    vmem_limit = int(min(max(int(footprint * 1.25), 32 * 1024 * 1024),
                         phys_vmem * 3 // 4))

    cost = pl.CostEstimate(
        flops=2 * Mp * Np * Kp,         # padded work actually executed
        transcendentals=0,
        bytes_accessed=(Mp * Kp * itemsize + Np * Kp * itemsize
                        + Np * 4 + Mp * Np * o_bytes),
    )

    kernel = _row_linear_kernel_multik if multi_k else _row_linear_kernel_singlek
    scratch = [pltpu.VMEM((tm, tn), jnp.float32)] if multi_k else []

    out2d = pl.pallas_call(
        kernel,
        out_shape=jax.ShapeDtypeStruct((Mp, Np), out_dtype),
        grid_spec=pltpu.PrefetchScalarGridSpec(
            num_scalar_prefetch=0,
            grid=grid,
            in_specs=[
                pl.BlockSpec((tm, tk), lambda i, j, k: (i, k)),   # x       (M, K)
                pl.BlockSpec((tn, tk), lambda i, j, k: (j, k)),   # weight  (N, K)
                pl.BlockSpec((1, tn), lambda i, j, k: (0, j)),    # bias f32 (1, N)
            ],
            out_specs=pl.BlockSpec((tm, tn), lambda i, j, k: (i, j)),
            scratch_shapes=scratch,
        ),
        compiler_params=pltpu.CompilerParams(
            dimension_semantics=("parallel", "parallel", "arbitrary"),
            vmem_limit_bytes=vmem_limit,
        ),
        cost_estimate=cost,
    )(x2d, w, bias2d)

    out2d = out2d[:M, :N]
    return out2d.reshape(*orig_shape[:-1], N)


if __name__ == "__main__":
    # Small shapes consistent with RowLinear(in_features=128, out_features=256).
    batch, seq = 2, 8
    in_features, out_features = 128, 256
    dtype = jnp.float32

    key = jax.random.PRNGKey(0)
    kx, kw, kb = jax.random.split(key, 3)

    x = jax.random.normal(kx, (batch, seq, in_features), dtype=dtype)
    weight = jax.random.normal(kw, (out_features, in_features), dtype=dtype) * 0.02
    bias = jax.random.normal(kb, (out_features,), dtype=dtype) * 0.01

    # TODO(synk): tp_size>1 allreduce, LoRA and fp8 gemm-plugin paths are not
    # implemented (single-device dense forward only).
    y = row_linear(x, weight, bias)
    y = jax.block_until_ready(y)

    y_ref = jnp.einsum("bsk,nk->bsn", x, weight) + bias
    assert y.shape == (batch, seq, out_features)
    assert jnp.allclose(y, y_ref, atol=1e-4, rtol=1e-4)

    # Also exercise the multi-K-step (accumulator) path and the bias=None case.
    x2 = jax.random.normal(kx, (4, 640), dtype=dtype)
    w2 = jax.random.normal(kw, (256, 640), dtype=dtype) * 0.02
    y2 = jax.block_until_ready(row_linear(x2, w2, None))
    y2_ref = x2 @ w2.T
    assert jnp.allclose(y2, y2_ref, atol=2e-3, rtol=2e-3)

    print("KERNEL_OK")
</pallas_src>

<mosaic_0001>
module attributes {stable_mosaic.version = 11 : i64} {
  func.func @_row_linear_kernel_singlek(%arg0: i32, %arg1: i32, %arg2: i32, %arg3: memref<16x128xf32, #tpu.memory_space<vmem>>, %arg4: memref<128x128xf32, #tpu.memory_space<vmem>>, %arg5: memref<1x128xf32, #tpu.memory_space<vmem>>, %arg6: memref<16x128xf32, #tpu.memory_space<vmem>>) attributes {dimension_semantics = [#tpu.dimension_semantics<parallel>, #tpu.dimension_semantics<parallel>, #tpu.dimension_semantics<arbitrary>], iteration_bounds = array<i64: 1, 2, 1>, scalar_prefetch = 0 : i64, scratch_operands = 0 : i64, tpu.core_type = #tpu.core_type<tc>, window_params = [{transform_indices = @transform_0, window_bounds = array<i64: 16, 128>}, {transform_indices = @transform_1, window_bounds = array<i64: 128, 128>}, {transform_indices = @transform_2, window_bounds = array<i64: 1, 128>}, {transform_indices = @transform_3, window_bounds = array<i64: 16, 128>}]} {
    %c0 = arith.constant 0 : index
    %c0_0 = arith.constant 0 : index
    %0 = vector.load %arg3[%c0, %c0_0] : memref<16x128xf32, #tpu.memory_space<vmem>>, vector<16x128xf32>
    %c0_1 = arith.constant 0 : index
    %c0_2 = arith.constant 0 : index
    %1 = vector.load %arg4[%c0_1, %c0_2] : memref<128x128xf32, #tpu.memory_space<vmem>>, vector<128x128xf32>
    %cst = arith.constant dense<0.000000e+00> : vector<16x128xf32>
    %2 = tpu.matmul %0, %1, %cst {dimension_numbers = #tpu.dot_dimension_numbers<[1], [1], [0], [0], [0, 0, 1, 0], [], []>} : vector<16x128xf32>, vector<128x128xf32>, vector<16x128xf32> -> vector<16x128xf32>
    %c0_3 = arith.constant 0 : index
    %c0_4 = arith.constant 0 : index
    %3 = vector.load %arg5[%c0_3, %c0_4] : memref<1x128xf32, #tpu.memory_space<vmem>>, vector<1x128xf32>
    %4 = vector.broadcast %3 : vector<1x128xf32> to vector<16x128xf32>
    %5 = arith.addf %2, %4 : vector<16x128xf32>
    %c0_5 = arith.constant 0 : index
    %c0_6 = arith.constant 0 : index
    %6 = vector.load %arg6[%c0_5, %c0_6] : memref<16x128xf32, #tpu.memory_space<vmem>>, vector<16x128xf32>
    tpu.vector_store %arg6[%c0_5, %c0_6], %5 {strides = array<i32>} : memref<16x128xf32, #tpu.memory_space<vmem>>, vector<16x128xf32>,
    return
  }
  func.func @transform_0(%arg0: i32, %arg1: i32, %arg2: i32) -> (i32, i32) {
    %c0_i32 = arith.constant 0 : i32
    return %arg0, %arg2 : i32, i32
  }
  func.func @transform_1(%arg0: i32, %arg1: i32, %arg2: i32) -> (i32, i32) {
    %c0_i32 = arith.constant 0 : i32
    return %arg1, %arg2 : i32, i32
  }
  func.func @transform_2(%arg0: i32, %arg1: i32, %arg2: i32) -> (i32, i32) {
    %c0_i32 = arith.constant 0 : i32
    %c0_i32_0 = arith.constant 0 : i32
    return %c0_i32, %arg1 : i32, i32
  }
  func.func @transform_3(%arg0: i32, %arg1: i32, %arg2: i32) -> (i32, i32) {
    %c0_i32 = arith.constant 0 : i32
    return %arg0, %arg1 : i32, i32
  }
}

</mosaic_0001>

<bundles_post_ra>
// kernel: tpu_custom_call.1
= control target key start
LH: loop header
LB: loop body
LE: loop exit
PB: predicated region body
PF: predicated region fallthrough
CT: control target
= control target key end

     0   :  { %8 = vsyncpa [#allocation3], 0  ;;  %s1091_s0 = inlined_call_operand.hbm [shape: f32[16,128], index: 0, kind: input, shape index: {}]   ;;  %s1092_s1 = inlined_call_operand.hbm [shape: f32[256,128], index: 1, kind: input, shape index: {}]   ;;  %s1093_s2 = inlined_call_operand.vmem [shape: f32[1,256], index: 2, kind: input, shape index: {}]   ;;  %s1094_s3 = inlined_call_operand.hbm [shape: f32[16,256], index: 3, kind: output, shape index: {}]  }
   0x1   :  { %9 = vsyncpa [#allocation6], 0 }
   0x2   :  { %11 = vsyncpa [#allocation6 + $0x1], 0 }
   0x3   :  { %12 = vsyncpa [#allocation4], 0 }
   0x4   :  { %14 = vsyncpa [#allocation4 + $0x1], 0  ;;  %s842_s12 = smov 0   ;;  %s844_s13 = smov 0  }
   0x5   :  { %s846_s14 = smov 0   ;;  %s848_s15 = smov 0  }
   0x6   :  { %s850_s16 = smov 0   ;;  %s852_s17 = smov 0  }
   0x7 LB: > { %s487_s18 = sadd.s32 4294967295, %s812_s17   ;;  %s488_s19 = sadd.s32 4294967294, %s812_s17   ;;  %s812_s17 = sphi %s852_s17, %s20_s17   ;;  %s808_s16 = sphi %s850_s16, %s1118_s16   ;;  %s804_s15 = sphi %s848_s15, %s1117_s15   ;;  %s800_s14 = sphi %s846_s14, %s1116_s14   ;;  %s796_s13 = sphi %s844_s13, %s1115_s13   ;;  %s792_s12 = sphi %s842_s12, %s1114_s12  }
   0x8   : > { %p89_p0 = scmp.ne.s32.totalorder %s796_s13, %s792_s12  ;;  %p876_p1 = scmp.eq.s32.totalorder %s487_s18, 0 }
   0x9   : > { %p880_p2 = scmp.eq.s32.totalorder %s487_s18, 1  ;;  %p147_p3 = scmp.eq.s32.totalorder %s488_s19, 1 }
   0xa   : > { %s1099_s20 = scalar_select %p876_p1, 1, 0 }
   0xb   : > { %s1100_s21 = scalar_select %p880_p2, 1, 0 }
   0xc   : > { %p886_p4 = por %p876_p1, %p89_p0  ;;  %p489_p5 = scmp.ge.s32.totalorder %s812_s17, 1 }
   0xd   : > { %p891_p6 = por %p147_p3, %p89_p0  ;;  %p154_p7 = scmp.lt.s32.totalorder %s812_s17, 3 }
   0xe   : > { %s1101_s22 = scalar_select %p886_p4, 1, 0 }
   0xf   : > { %s1102_s23 = scalar_select %p891_p6, 1, 0 }
  0x10   : > { %p896_p8 = pnand %p489_p5, %p154_p7  ;;  %s814_s25 = smov [#allocation2]  }
  0x11   : > { %s170_s26 = sshll.u32 %s814_s25, 4  ;;  %s35_s28 = sadd.s32 1, %s808_s16  ;;  %s171_s26 = int_to_ptr.vmem [resolvable:$true] %s170_s26 }
  0x12   : > { %s1103_s24 = scalar_select %p896_p8, 1, 0 }
  0x13   : > { %p598_p9 = pneg %p896_p8  ;;  %s668_s4 = scalar_lea.hbm %s1091_s0, 256 }
  0x14   : > { %p669_p12 = scmp.ne.s32.totalorder %s1091_s0, %s668_s4  ;;  %p675_p5 = scmp.lt.u32.totalorder %s668_s4, %s1091_s0 }
  0x15   : > { %p905_p11 = pnand %p598_p9, %p876_p1 }
  0x17   : > { %p670_p13 = pneg %p905_p11 }
  0x19   : > { %p671_p0 = pnand %p670_p13, %p669_p12 }
  0x1b   : > { %p672_p3 = pneg %p671_p0 }
  0x1d   : > { %p677_p7 = pnand %p675_p5, %p672_p3 }
  0x1f   : > { %680 = shalt.err (!%p677_p7)
}
  0x20   : > { %s681_s9 = scalar_lea.vmem %s171_s26, 256  ;;  %p689_p4 = scmp.lt.s32.totalorder %s171_s26, %s171_s26 }
  0x21   : > { %p682_p9 = scmp.ne.s32.totalorder %s171_s26, %s681_s9  ;;  %p690_p1 = scmp.lt.s32.totalorder %s681_s9, %s681_s9 }
  0x23   : > { %p684_p10 = pnand %p682_p9, %p670_p13  ;;  %p691_p8 = por %p690_p1, %p689_p4 }
  0x25   : > { %p685_p6 = pneg %p684_p10 }
  0x27   : > { %p692_p2 = pnand %p691_p8, %p685_p6 }
  0x29   : > { %695 = shalt.err (!%p692_p2)
}
  0x2a   : > { %s815_s10 = smov 128   ;;  %s816_s11 = smov 8  }
  0x2b   : > { %601 = dma.hbm_to_vmem [thread:$0]  (!%p905_p11), %s1091_s0, 256, %s171_s26, [#allocation3], %s815_s10, %s815_s10, %s816_s11  }
  0x2c   : > { %p37_p1 = scmp.ge.s32.totalorder %s35_s28, 2  ;;  %s76_s25 = sadd.s32 1, %s800_s14 }
  0x2d   : > { %p83_p2 = scmp.ne.s32.totalorder %s800_s14, %s796_s13  ;;  %p84_p4 = scmp.eq.s32.totalorder %s812_s17, 0 }
  0x2e   : > { %s1120_s28 = smov (%p37_p1, %s35_s28), 0  ;;  %p1106_p8 = scmp.ne.s32.totalorder %s1100_s21, 0 }
  0x2f   : > { %p935_p6 = por %p84_p4, %p83_p2  ;;  %s71_s30 = ssub.s32 %s808_s16, %s1120_s28 }
  0x30   : > { %p941_p10 = por %p1106_p8, %p83_p2  ;;  %p611_p12 = scmp.lt.s32.totalorder %s812_s17, 2 }
  0x31   : > { %p74_p11 = scmp.eq.s32.totalorder %s71_s30, 0  ;;  %s184_s26 = sand.u32 1, %s800_s14  }
  0x32   : > { %s492_s4 = sshll.u32 %s184_s26, 7  ;;  %s504_s6 = sshll.u32 %s808_s16, 11 }
  0x33   : > { %s950_s5 = scalar_select %p74_p11, %s800_s14, %s76_s25  }
  0x34   : > { %s956_s9 = scalar_lea.hbm %s1092_s1, %s504_s6  ;;  %s188_s21 = scalar_lea.vmem [#allocation5], %s492_s4 }
  0x35   : > { %s196_s18 = sshll.u32 %s188_s21, 4  ;;  %p962_p13 = pnand %p611_p12, %p935_p6  ;;  %s958_s18 = int_to_ptr.vmem [resolvable:$true] %s196_s18 }
  0x36   : > { %s966_s25 = scalar_lea.sflag [#allocation6], %s184_s26  ;;  %s696_s30 = scalar_lea.hbm %s956_s9, 2048 }
  0x37   : > { %p697_p0 = scmp.ne.s32.totalorder %s956_s9, %s696_s30  ;;  %p698_p3 = pneg %p962_p13 }
  0x38   : > { %s701_s29 = scalar_lea.hbm %s1092_s1, 4096  ;;  %p702_p9 = scmp.lt.u32.totalorder %s956_s9, %s1092_s1 }
  0x39   : > { %p699_p5 = pnand %p698_p3, %p697_p0  ;;  %p703_p1 = scmp.lt.u32.totalorder %s701_s29, %s696_s30 }
  0x3a   : > { %p705_p4 = scmp.lt.u32.totalorder %s696_s30, %s956_s9 }
  0x3b   : > { %p700_p7 = pneg %p699_p5  ;;  %p704_p2 = por %p703_p1, %p702_p9 }
  0x3d   : > { %p706_p6 = por %p705_p4, %p704_p2 }
  0x3f   : > { %p707_p8 = pnand %p706_p6, %p700_p7 }
  0x41   : > { %710 = shalt.err (!%p707_p8)
}
  0x42   : > { %s711_s26 = scalar_lea.vmem %s958_s18, 2048  ;;  %s817_s21 = smov [#allocation5]  }
  0x43   : > { %p712_p12 = scmp.ne.s32.totalorder %s958_s18, %s711_s26  ;;  %s716_s4 = sshll.u32 %s817_s21, 4  ;;  %s717_s4 = int_to_ptr.vmem [resolvable:$false] %s716_s4 }
  0x44   : > { %s718_s6 = scalar_lea.vmem %s717_s4, 4096  ;;  %p719_p5 = scmp.lt.s32.totalorder %s958_s18, %s717_s4 }
  0x45   : > { %p714_p11 = pnand %p712_p12, %p698_p3  ;;  %p720_p9 = scmp.lt.s32.totalorder %s718_s6, %s711_s26 }
  0x47   : > { %p715_p0 = pneg %p714_p11  ;;  %p721_p1 = por %p720_p9, %p719_p5 }
  0x49   : > { %p722_p2 = pnand %p721_p1, %p715_p0 }
  0x4b   : > { %725 = shalt.err (!%p722_p2)
}
  0x4c   : > { %605 = dma.hbm_to_vmem [thread:$0]  (!%p962_p13), %s956_s9, 2048, %s958_s18, %s966_s25, %s815_s10, %s815_s10, %s816_s11  }
  0x4d   : > { %p1109_p3 = scmp.ne.s32.totalorder %s1103_s24, 0 }
  0x4e   : > { %p1110_p7 = scmp.ne.s32.totalorder (!%p1109_p3), %s1099_s20, 0 }
  0x4f   : > { %214 = sbr.rel (%p1109_p3) target bundleno = 389 (0x185), region = 32 }
  0x56   : > { %779 = dma.done.wait (%p1110_p7), [#allocation3], 256  }
  0x57   : > { %781 = vsyncadd (%p1110_p7), [#allocation3], 4294967040  ;;  %s1004_s30 = sand.u32 1, %s796_s13   ;;  %p1111_p13 = scmp.ne.s32.totalorder %s1101_s22, 0 }
  0x58   : > { %s497_s19 = sshll.u32 %s1004_s30, 7  ;;  %s221_s29 = scalar_lea.sflag [#allocation6], %s1004_s30 }
  0x59   : > { %s1008_s7 = scalar_lea.vmem [#allocation5], %s497_s19 }
  0x5a   : > { %783 = dma.done.wait (%p1111_p13), %s221_s29, 2048  }
  0x5b   : > { %785 = vsyncadd (%p1111_p13), %s221_s29, 4294965248  ;;  %v258_v0 = vld [vmem:[%s1008_s7] sm:$0xff]  ;;  %v259_v1 = vld [vmem:[%s1008_s7 + $0x8] sm:$0xff]  ;;  %p252_p4 = scmp.lt.s32.totalorder %s804_s15, 1  ;;  %s498_s20 = sshll.u32 %s1004_s30, 4 }
  0x5c   : > { %v260_v2 = vld [vmem:[%s1008_s7 + $0x10] sm:$0xff]  ;;  %v558_v3 = vpack.c.bf16 %v259_v1, %v258_v0  ;;  %v261_v4 = vld [vmem:[%s1008_s7 + $0x18] sm:$0xff]  ;;  %v262_v7 = vld [vmem:[%s1008_s7 + $0x20] sm:$0xff]  ;;  %s249_s9 = scalar_lea.vmem [#allocation7], %s498_s20  ;;  %s501_s25 = sshll.u32 %s804_s15, 7 }
  0x5d   : > { %v562_v5 = vpack.c.bf16 %v261_v4, %v260_v2  ;;  %v256_v6 = vld [vmem:[#allocation2] sm:$0xff]  ;;  %v263_v8 = vld [vmem:[%s1008_s7 + $0x28] sm:$0xff]  ;;  %v265_v11 = vld [vmem:[%s1008_s7 + $0x38] sm:$0xff]  ;;  %s253_s22 = scalar_select %p252_p4, %s804_s15, 1 }
  0x5e   : > { %559 = vmatprep.subr.bf16.mxu0 %v558_v3  ;;  %555 = vmatprep.mubr.f32.mxu0 %v256_v6  ;;  %v566_v9 = vpack.c.bf16 %v263_v8, %v262_v7  ;;  %v264_v10 = vld [vmem:[%s1008_s7 + $0x30] sm:$0xff]  ;;  %v266_v13 = vld [vmem:[%s1008_s7 + $0x40] sm:$0xff]  ;;  %v267_v14 = vld [vmem:[%s1008_s7 + $0x48] sm:$0xff]  ;;  %s374_s18 = sshll.u32 %s249_s9, 4  ;;  %s1042_s21 = scalar_lea.hbm %s1094_s3, %s501_s25  ;;  %s1037_s18 = int_to_ptr.vmem [resolvable:$true] %s374_s18 }
  0x5f   : > { %561 = vmatpush3.bf16.xpose.msra.mxu0 %v558_v3  ;;  %v570_v12 = vpack.c.bf16 %v265_v11, %v264_v10  ;;  %v574_v15 = vpack.c.bf16 %v267_v14, %v266_v13  ;;  %v268_v16 = vld [vmem:[%s1008_s7 + $0x50] sm:$0xff]  ;;  %v269_v17 = vld [vmem:[%s1008_s7 + $0x58] sm:$0xff]  ;;  %v270_v19 = vld [vmem:[%s1008_s7 + $0x60] sm:$0xff]  ;;  %s254_s11 = scalar_lea.vmem %s1093_s2, %s253_s22  ;;  %s359_s4 = scalar_lea.sflag [#allocation4], %s1004_s30 }
  0x60   : > { %563 = vmatprep.subr.bf16.mxu0 %v562_v5  ;;  %v578_v18 = vpack.c.bf16 %v269_v17, %v268_v16  ;;  %v271_v20 = vld [vmem:[%s1008_s7 + $0x68] sm:$0xff]  ;;  %v272_v22 = vld [vmem:[%s1008_s7 + $0x70] sm:$0xff]  ;;  %v273_v23 = vld [vmem:[%s1008_s7 + $0x78] sm:$0xff]  ;;  %s726_s6 = scalar_lea.vmem %s1037_s18, 256  ;;  %s818_s15 = smov [#allocation7]  }
  0x61   : > { %v582_v21 = vpack.c.bf16 %v271_v20, %v270_v19  ;;  %v586_v24 = vpack.c.bf16 %v273_v23, %v272_v22  ;;  %v257_v25 = vld [vmem:[#allocation2 + $0x8] sm:$0xff]  ;;  %v499_v26 = vld [vmem:[%s254_s11] ss:$0 sm:$0xff]  ;;  %p727_p6 = scmp.ne.s32.totalorder %s1037_s18, %s726_s6  ;;  %s730_s19 = sshll.u32 %s818_s15, 4  ;;  %s731_s19 = int_to_ptr.vmem [resolvable:$false] %s730_s19 }
  0x62   : > { %s732_s29 = scalar_lea.vmem %s731_s19, 512  ;;  %p733_p11 = scmp.lt.s32.totalorder %s1037_s18, %s731_s19 }
  0x63   : > { %p728_p8 = pnand %p727_p6, %p941_p10  ;;  %p734_p0 = scmp.lt.s32.totalorder %s732_s29, %s726_s6 }
  0x65   : > { %p729_p12 = pneg %p728_p8  ;;  %p735_p5 = por %p734_p0, %p733_p11 }
  0x67   : > { %565 = vmatpush3.bf16.xpose.msra.mxu0 %v562_v5  ;;  %p736_p9 = pnand %p735_p5, %p729_p12 }
  0x68   : > { %567 = vmatprep.subr.bf16.mxu0 %v566_v9 }
  0x6f   : > { %569 = vmatpush3.bf16.xpose.msra.mxu0 %v566_v9 }
  0x70   : > { %571 = vmatprep.subr.bf16.mxu0 %v570_v12 }
  0x77   : > { %573 = vmatpush3.bf16.xpose.msra.mxu0 %v570_v12 }
  0x78   : > { %575 = vmatprep.subr.bf16.mxu0 %v574_v15 }
  0x7f   : > { %577 = vmatpush3.bf16.xpose.msra.mxu0 %v574_v15 }
  0x80   : > { %579 = vmatprep.subr.bf16.mxu0 %v578_v18 }
  0x87   : > { %581 = vmatpush3.bf16.xpose.msra.mxu0 %v578_v18 }
  0x88   : > { %583 = vmatprep.subr.bf16.mxu0 %v582_v21 }
  0x8f   : > { %585 = vmatpush3.bf16.xpose.msra.mxu0 %v582_v21 }
  0x90   : > { %587 = vmatprep.subr.bf16.mxu0 %v586_v24 }
  0x97   : > { %589 = vmatpush3.bf16.xpose.msra.mxu0 %v586_v24 }
  0x9e   : > { %556 = vmatmul.mubr.f32.vlgmr.msra.gmra.mrb[0].mxu0 %v257_v25 }
 0x171   : > { %v557_v27 = vpop.f32.mrb[0].mxu0 }
 0x172   : > { %v353_v28 = vadd.f32 %v557_v27, %v499_v26  ;;  %v347_v29 = vpop.f32.mrb[1].mxu0 }
 0x173   : > { %v348_v30 = vadd.f32 %v499_v26, %v347_v29 }
 0x174   : > { %357 = vst [vmem:[%s249_s9 + $0x8] sm:$0xff] %v353_v28 }
 0x175   : > { %356 = vst [vmem:[%s249_s9] sm:$0xff] %v348_v30 }
 0x176   : > { %739 = shalt.err (!%p736_p9)
}
 0x177   : > { %s740_s7 = scalar_lea.hbm %s1042_s21, 256  ;;  %s744_s24 = scalar_lea.hbm %s1094_s3, 512 }
 0x178   : > { %p741_p1 = scmp.ne.s32.totalorder %s1042_s21, %s740_s7  ;;  %p745_p7 = scmp.lt.u32.totalorder %s1042_s21, %s1094_s3 }
 0x179   : > { %p746_p13 = scmp.lt.u32.totalorder %s744_s24, %s740_s7  ;;  %p748_p6 = scmp.lt.u32.totalorder %s740_s7, %s1042_s21 }
 0x17a   : > { %p742_p2 = pnand %p741_p1, %p941_p10 }
 0x17b   : > { %p747_p4 = por %p746_p13, %p745_p7 }
 0x17c   : > { %p743_p3 = pneg %p742_p2 }
 0x17d   : > { %p749_p8 = por %p748_p6, %p747_p4 }
 0x17f   : > { %p750_p12 = pnand %p749_p8, %p743_p3 }
 0x181   : > { %753 = shalt.err (!%p750_p12)
}
 0x182   : > { %s819_s9 = smov 128   ;;  %s820_s25 = smov 256  }
 0x183   : > { %s821_s8 = smov 8  }
 0x184   : > { %596 = dma.vmem_to_hbm [thread:$0]  (%p941_p10), %s1037_s18, 256, %s1042_s21, %s359_s4, %s819_s9, %s820_s25, %s821_s8  }
 0x185 PF: > { %s389_s26 = sand.u32 1, %s792_s12   ;;  %p1112_p11 = scmp.ne.s32.totalorder %s1102_s23, 0 }
 0x186   : > { %p1113_p0 = scmp.ge.s32.totalorder %s812_s17, 2  ;;  %s390_s6 = scalar_lea.sflag [#allocation4], %s389_s26 }
 0x188   : > { %p607_p5 = pnand %p1113_p0, %p1112_p11 }
 0x18a   : > { %787 = dma.done.wait (!%p607_p5), %s390_s6, 256  }
 0x18b   : > { %789 = vsyncadd (!%p607_p5), %s390_s6, 4294967040  ;;  %s20_s17 = sadd.s32 1, %s812_s17   ;;  %s1114_s12 = smov %s796_s13 }
 0x18c   : > { %p17_p9 = scmp.ge.s32.totalorder %s20_s17, 4   ;;  %s1115_s13 = smov %s800_s14 }
 0x18d   : > { %s1116_s14 = smov %s950_s5  ;;  %s1117_s15 = smov %s808_s16 }
 0x18e   : > { %s1118_s16 = smov %s1120_s28  ;;  %19 = sbr.rel (!%p17_p9) target bundleno = 7 (0x7), region = 86 }
 0x195   :  { %395 = vsyncpa [#allocation3], 1 }
 0x196   :  { %397 = vsyncpa [#allocation3 + $0x1], 1 }
 0x197   :  { %398 = vsyncpa [#allocation6], 1 }
 0x198   :  { %400 = vsyncpa [#allocation6 + $0x1], 1 }
 0x199   :  { %401 = vsyncpa [#allocation4], 1 }
 0x19a   :  { %403 = vsyncpa [#allocation4 + $0x1], 1 }

</bundles_post_ra>
